<compile_context>
chip_gen: v6e
topology: v6e:2x2x1
jax: 0.10.0
libtpu: 0.0.40
codegen_flags: <defaults>
</compile_context>

<pallas_src>
import jax
import jax.numpy as jnp
import numpy as np
from jax.experimental import pallas as pl
from jax.experimental.pallas import tpu as pltpu

HIDDEN = 256  # ClassifierModule hard-codes nn.Linear(feature_size, 256)


# ----------------------------- helpers ---------------------------------------
def _round_up(v, m):
    return ((v + m - 1) // m) * m


def _vmem_capacity_bytes():
    try:
        return int(pltpu.get_tpu_info().vmem_capacity_bytes)
    except Exception:
        return 64 << 20  # v7x has the smallest VMEM; safe floor for all gens


def _choose_block_c(C, B, F_pad, H, budget_bytes):
    """Largest class block whose double-buffered VMEM footprint fits `budget_bytes`.

    Constraints:
      * multiple of 128 so the (B, block_c) output store is lane-dense and the
        class axis of the x tile stays sublane-aligned,
      * at most C // 2 so the class grid keeps >= 2 steps (v7x megacore split,
        BlockSpec double-buffering overlap),
      * if C <= 128 the whole problem is one block (block dims then equal the
        full array dims, which also satisfies the (8,128) rule).
    """
    if C <= 128:
        return C

    def footprint(bc):
        w1_tile = bc * F_pad * H * 2          # bf16 weights (dominant stream)
        x_tile = B * bc * F_pad * 2           # bf16 activations
        aux_tile = bc * 3 * H * 4             # f32 packed b1/w2/b2
        out_tile = B * bc * 4                 # f32 logits
        h_live = bc * B * H * 4               # f32 layer-1 activations in-kernel
        return 2 * (w1_tile + x_tile + aux_tile + out_tile) + 2 * h_live

    bc = 128
    while bc + 128 <= C // 2 and footprint(bc + 128) <= budget_bytes:
        bc += 128
    return bc


# ----------------------------- kernel -----------------------------------------
def _classifier_head_kernel(x_ref, w1_ref, aux_ref, out_ref):
    # Per grid step (bc = classes handled this step):
    #   x_ref   : (B, bc, F_pad)  bf16  activations of this class block
    #   w1_ref  : (bc, F_pad, H)  bf16  layer-1 weights (streamed HBM->VMEM)
    #   aux_ref : (bc, 3, H)      f32   packed [b1 ; w2 ; b2-broadcast]
    #   out_ref : (B, bc)         f32   lane-dense logits block
    x = x_ref[...]
    w1 = w1_ref[...]
    aux = aux_ref[...]

    # Layer 1 for the whole class block: one batched MXU contraction
    # (batch dim = class, contraction = padded feature), f32 accumulation.
    h = jnp.einsum("bcf,cfh->cbh", x, w1,
                   preferred_element_type=jnp.float32)      # (bc, B, H) f32

    b1 = aux[:, 0:1, :]                                      # (bc, 1, H)
    w2 = aux[:, 1:2, :]                                      # (bc, 1, H)
    b2 = aux[:, 2:3, 0]                                      # (bc, 1)

    h = jnp.maximum(h + b1, 0.0)                             # bias + ReLU (VPU, f32)
    logits = jnp.sum(h * w2, axis=-1) + b2                   # layer 2 (H->1): mul + reduce

    # Lane axis of the store = class block (multiple of 128, or == C): unmasked vst.
    out_ref[...] = logits.T.astype(out_ref.dtype)            # (B, bc)


# ----------------------------- wrappers ----------------------------------------
def prepare_params(params, *, batch_size, weights_dtype=jnp.bfloat16):
    """One-time packing of the per-class weights into kernel-friendly layouts.

    params: {"w1": (C,F,H), "b1": (C,H), "w2": (C,H), "b2": (C,)} float32,
            with w1/w2 already in `x @ W` layout (torch weight.T per class).
    """
    w1, b1, w2, b2 = params["w1"], params["b1"], params["w2"], params["b2"]
    C, F, H = w1.shape
    assert H == HIDDEN

    F_pad = _round_up(F, 128)                 # lane axis of x tile, sublane axis of W1
    vmem_cap = _vmem_capacity_bytes()
    block_c = _choose_block_c(C, batch_size, F_pad, H, (vmem_cap * 7) // 10)
    C_pad = _round_up(C, block_c)

    # W1: zero-pad F and C, stream in bf16 (memory-bound: halves HBM bytes).
    w1p = jnp.pad(w1, ((0, C_pad - C), (0, F_pad - F), (0, 0))).astype(weights_dtype)

    # Pack the three tiny per-class tensors into ONE (C_pad, 3, H) f32 array
    # (one small DMA per step instead of three sub-vreg-sized ones).
    aux = jnp.stack(
        [b1, w2, jnp.broadcast_to(b2[:, None], (C, H))], axis=1
    ).astype(jnp.float32)
    aux = jnp.pad(aux, ((0, C_pad - C), (0, 0), (0, 0)))

    return dict(
        w1=w1p, aux=aux,
        num_classes=C, feature_size=F,
        C_pad=C_pad, F_pad=F_pad, block_c=block_c,
        x_dtype=weights_dtype,
        vmem_limit=int(vmem_cap * 0.9),
    )


def stream_classification_head_forward(x, prepared):
    """x: (B, C, F) float32 (PyTorch layout). Returns logits (B, C) float32."""
    B, C, F = x.shape
    assert C == prepared["num_classes"] and F == prepared["feature_size"]
    C_pad, F_pad = prepared["C_pad"], prepared["F_pad"]
    block_c, H = prepared["block_c"], HIDDEN
    grid = (C_pad // block_c,)

    # x stays (B, C, F): no HBM transpose. Pad class/feature axes once and cast
    # to bf16 (memory-bound streaming; MXU-native input dtype).
    xp = jnp.pad(x, ((0, 0), (0, C_pad - C), (0, F_pad - F))).astype(prepared["x_dtype"])

    out = pl.pallas_call(
        _classifier_head_kernel,
        out_shape=jax.ShapeDtypeStruct((B, C_pad), jnp.float32),
        grid=grid,
        in_specs=[
            pl.BlockSpec((B, block_c, F_pad), lambda i: (0, i, 0)),   # activations
            # W1 is the dominant stream; if profiling shows exposed DMA between
            # steps, add pipeline_mode=pl.Buffered(3) on this spec only.
            pl.BlockSpec((block_c, F_pad, H), lambda i: (i, 0, 0)),   # W1 (streamed)
            pl.BlockSpec((block_c, 3, H), lambda i: (i, 0, 0)),       # packed b1/w2/b2
        ],
        out_specs=pl.BlockSpec((B, block_c), lambda i: (0, i)),       # lane-dense store
        compiler_params=pltpu.CompilerParams(
            dimension_semantics=("parallel",),          # classes are independent
            vmem_limit_bytes=prepared["vmem_limit"],
        ),
    )(xp, prepared["w1"], prepared["aux"])

    return out[:, :C]


# --------------------------- parameter construction ---------------------------
def init_params(key, feature_size, num_classes, hidden=HIDDEN):
    k1, k2, k3, k4 = jax.random.split(key, 4)
    w1 = 0.05 * jax.random.normal(k1, (num_classes, feature_size, hidden), jnp.float32)
    b1 = 0.05 * jax.random.normal(k2, (num_classes, hidden), jnp.float32)
    w2 = 0.05 * jax.random.normal(k3, (num_classes, hidden), jnp.float32)
    b2 = 0.05 * jax.random.normal(k4, (num_classes,), jnp.float32)
    return {"w1": w1, "b1": b1, "w2": w2, "b2": b2}


# --------------------------- pure-JAX reference ---------------------------
def reference_forward(x, p):
    # out[b, c] = relu(x[b, c, :] @ w1[c] + b1[c]) @ w2[c] + b2[c]
    h = jnp.maximum(jnp.einsum("bcf,cfh->bch", x, p["w1"]) + p["b1"][None], 0.0)
    return jnp.einsum("bch,ch->bc", h, p["w2"]) + p["b2"][None]


if __name__ == "__main__":
    B, C, F = 2, 4, 32   # batch, num_classes, feature_size (hidden = 256 per module)

    key = jax.random.PRNGKey(0)
    kx, kp = jax.random.split(key)
    x = jax.random.normal(kx, (B, C, F), jnp.float32)
    params = init_params(kp, F, C)

    prepared = prepare_params(params, batch_size=B)
    out = stream_classification_head_forward(x, prepared)
    out = jax.block_until_ready(out)
    assert out.shape == (B, C)

    # Reference applies the same bf16 rounding to the streamed operands (x, W1)
    # so the check isolates kernel correctness; all arithmetic is f32 end-to-end.
    q = lambda a: a.astype(jnp.bfloat16).astype(jnp.float32)
    ref = reference_forward(
        q(x),
        {"w1": q(params["w1"]), "b1": params["b1"],
         "w2": params["w2"], "b2": params["b2"]},
    )
    np.testing.assert_allclose(np.asarray(out), np.asarray(ref), rtol=5e-4, atol=1e-5)

    print("KERNEL_OK")
</pallas_src>

<mosaic_0001>
module attributes {stable_mosaic.version = 11 : i64} {
  func.func @_classifier_head_kernel(%arg0: i32, %arg1: memref<2x4x128xbf16, #tpu.memory_space<vmem>>, %arg2: memref<4x128x256xbf16, #tpu.memory_space<vmem>>, %arg3: memref<4x3x256xf32, #tpu.memory_space<vmem>>, %arg4: memref<2x4xf32, #tpu.memory_space<vmem>>) attributes {dimension_semantics = [#tpu.dimension_semantics<parallel>], iteration_bounds = array<i64: 1>, scalar_prefetch = 0 : i64, scratch_operands = 0 : i64, tpu.core_type = #tpu.core_type<tc>, window_params = [{transform_indices = @transform_0, window_bounds = array<i64: 2, 4, 128>}, {transform_indices = @transform_1, window_bounds = array<i64: 4, 128, 256>}, {transform_indices = @transform_2, window_bounds = array<i64: 4, 3, 256>}, {transform_indices = @transform_3, window_bounds = array<i64: 2, 4>}]} {
    %c0 = arith.constant 0 : index
    %c0_0 = arith.constant 0 : index
    %c0_1 = arith.constant 0 : index
    %0 = vector.load %arg1[%c0, %c0_0, %c0_1] : memref<2x4x128xbf16, #tpu.memory_space<vmem>>, vector<2x4x128xbf16>
    %c0_2 = arith.constant 0 : index
    %c0_3 = arith.constant 0 : index
    %c0_4 = arith.constant 0 : index
    %1 = vector.load %arg2[%c0_2, %c0_3, %c0_4] : memref<4x128x256xbf16, #tpu.memory_space<vmem>>, vector<4x128x256xbf16>
    %c0_5 = arith.constant 0 : index
    %c0_6 = arith.constant 0 : index
    %c0_7 = arith.constant 0 : index
    %2 = vector.load %arg3[%c0_5, %c0_6, %c0_7] : memref<4x3x256xf32, #tpu.memory_space<vmem>>, vector<4x3x256xf32>
    "tpu.trace_start"() <{level = 10 : i32, message = "bcf,cfh->cbh"}> : () -> ()
    %cst = arith.constant dense<0.000000e+00> : vector<4x2x256xf32>
    %3 = tpu.matmul %0, %1, %cst {dimension_numbers = #tpu.dot_dimension_numbers<[2], [1], [0], [2], [0, 1, 0, 0, 1, 2], [1], [0]>} : vector<2x4x128xbf16>, vector<4x128x256xbf16>, vector<4x2x256xf32> -> vector<4x2x256xf32>
    "tpu.trace_stop"() : () -> ()
    %4 = vector.extract_strided_slice %2 {offsets = [0, 0, 0], sizes = [4, 1, 256], strides = [1, 1, 1]} : vector<4x3x256xf32> to vector<4x1x256xf32>
    %5 = vector.extract_strided_slice %2 {offsets = [0, 1, 0], sizes = [4, 1, 256], strides = [1, 1, 1]} : vector<4x3x256xf32> to vector<4x1x256xf32>
    %6 = vector.extract_strided_slice %2 {offsets = [0, 2, 0], sizes = [4, 1, 1], strides = [1, 1, 1]} : vector<4x3x256xf32> to vector<4x1x1xf32>
    %7 = vector.shape_cast %6 : vector<4x1x1xf32> to vector<4x1xf32>
    %8 = vector.broadcast %4 : vector<4x1x256xf32> to vector<4x2x256xf32>
    %9 = arith.addf %3, %8 : vector<4x2x256xf32>
    %cst_8 = arith.constant 0.000000e+00 : f32
    %10 = vector.broadcast %cst_8 : f32 to vector<4x2x256xf32>
    %11 = arith.maximumf %9, %10 : vector<4x2x256xf32>
    %12 = vector.broadcast %5 : vector<4x1x256xf32> to vector<4x2x256xf32>
    %13 = arith.mulf %11, %12 : vector<4x2x256xf32>
    %cst_9 = arith.constant dense<0.000000e+00> : vector<4x2xf32>
    %14 = vector.multi_reduction <add>, %13, %cst_9 [2] : vector<4x2x256xf32> to vector<4x2xf32>
    %15 = vector.broadcast %7 : vector<4x1xf32> to vector<4x2xf32>
    %16 = arith.addf %14, %15 : vector<4x2xf32>
    %17 = tpu.transpose %16, [1, 0] : vector<4x2xf32> -> vector<2x4xf32>
    %c0_10 = arith.constant 0 : index
    %c0_11 = arith.constant 0 : index
    %18 = vector.load %arg4[%c0_10, %c0_11] : memref<2x4xf32, #tpu.memory_space<vmem>>, vector<2x4xf32>
    tpu.vector_store %arg4[%c0_10, %c0_11], %17 {strides = array<i32>} : memref<2x4xf32, #tpu.memory_space<vmem>>, vector<2x4xf32>,
    return
  }
  func.func @transform_0(%arg0: i32) -> (i32, i32, i32) {
    %c0_i32 = arith.constant 0 : i32
    %c0_i32_0 = arith.constant 0 : i32
    %c0_i32_1 = arith.constant 0 : i32
    return %c0_i32, %arg0, %c0_i32_0 : i32, i32, i32
  }
  func.func @transform_1(%arg0: i32) -> (i32, i32, i32) {
    %c0_i32 = arith.constant 0 : i32
    %c0_i32_0 = arith.constant 0 : i32
    %c0_i32_1 = arith.constant 0 : i32
    return %arg0, %c0_i32, %c0_i32_0 : i32, i32, i32
  }
  func.func @transform_2(%arg0: i32) -> (i32, i32, i32) {
    %c0_i32 = arith.constant 0 : i32
    %c0_i32_0 = arith.constant 0 : i32
    %c0_i32_1 = arith.constant 0 : i32
    return %arg0, %c0_i32, %c0_i32_0 : i32, i32, i32
  }
  func.func @transform_3(%arg0: i32) -> (i32, i32) {
    %c0_i32 = arith.constant 0 : i32
    %c0_i32_0 = arith.constant 0 : i32
    return %c0_i32, %arg0 : i32, i32
  }
}

</mosaic_0001>

<bundles_post_ra>
// kernel: tpu_custom_call.1
= control target key start
LH: loop header
LB: loop body
LE: loop exit
PB: predicated region body
PF: predicated region fallthrough
CT: control target
= control target key end

     0   :  { %8 = vsyncpa [#allocation3], 0  ;;  %s1297_s0 = inlined_call_operand.vmem [shape: bf16[2,4,128], index: 0, kind: input, shape index: {}]   ;;  %s1298_s1 = inlined_call_operand.hbm [shape: bf16[4,128,256], index: 1, kind: input, shape index: {}]   ;;  %s1299_s2 = inlined_call_operand.vmem [shape: f32[4,3,256], index: 2, kind: input, shape index: {}]   ;;  %s1300_s3 = inlined_call_operand.hbm [shape: f32[2,4], index: 3, kind: output, shape index: {}]  }
   0x1   :  { %9 = vsyncpa [#allocation4], 0  ;;  %s1169_s12 = smov [#allocation2]  }
   0x2   :  { %s17_s13 = sshll.u32 %s1169_s12, 4  ;;  %s18_s13 = int_to_ptr.vmem [resolvable:$true] %s17_s13 }
   0x3   :  { %s1133_s14 = scalar_lea.vmem %s18_s13, 8192  ;;  %p1138_p1 = scmp.lt.s32.totalorder %s18_s13, %s18_s13 }
   0x4   :  { %p1134_p0 = scmp.ne.s32.totalorder %s18_s13, %s1133_s14  ;;  %p1139_p2 = scmp.lt.s32.totalorder %s1133_s14, %s1133_s14 }
   0x6   :  { %p1140_p3 = por %p1139_p2, %p1138_p1 }
   0x8   :  { %p1141_p4 = pnand %p1140_p3, %p1134_p0 }
   0xa   :  { %1144 = shalt.err (!%p1141_p4)
}
   0xb   :  { %s1170_s15 = smov 128   ;;  %s1171_s16 = smov 8  }
   0xc   :  { %23 = dma.hbm_to_vmem [thread:$0]  %s1298_s1, 8192, %s18_s13, [#allocation3], %s1170_s15, %s1170_s15, %s1171_s16  }
   0xd   :  { %1165 = dma.done.wait [#allocation3], 8192  }
   0xe   :  { %1166 = vsyncadd [#allocation3], 4294959104  ;;  %v1172_v0 = vmov 0   ;;  %v1029_v1 = vld [vmem:[#allocation2 + $0x74] ss:$8 sps:$4 sm:$0xff]   ;;  %v104_v24 = vlaneseq  ;;  %vm772_vm0 = vcmask 1041408  }
   0xf   :  { %312 = vmatprep.mubr.bf16.mxu0 %v1172_v0  ;;  %433 = vmatprep.mubr.bf16.mxu1 %v1172_v0  ;;  %v1031_v2 = vld [vmem:[#allocation2 + $0xf4] ss:$8 sps:$4 sm:$0xff]   ;;  %v1033_v3 = vld [vmem:[#allocation2 + $0x70] ss:$8 sps:$4 sm:$0xff]   ;;  %v1035_v5 = vld [vmem:[#allocation2 + $0x64] ss:$8 sps:$4 sm:$0xff]  }
  0x10   :  { %1028 = vset.pattern.permute.xlu1 %v1172_v0  ;;  %1027 = vset.pattern.permute.xlu0 %v1172_v0  ;;  %v1034_v4 = vld [vmem:[#allocation2 + $0xf0] ss:$8 sps:$4 sm:$0xff]   ;;  %v1037_v6 = vld [vmem:[#allocation2 + $0xe4] ss:$8 sps:$4 sm:$0xff]   ;;  %v1039_v7 = vld [vmem:[#allocation2 + $0x60] ss:$8 sps:$4 sm:$0xff]  }
  0x11   :  { %280 = vmatprep.subr.bf16.mxu0 %v1029_v1  ;;  %401 = vmatprep.subr.bf16.mxu1 %v1031_v2  ;;  %v1040_v8 = vld [vmem:[#allocation2 + $0xe0] ss:$8 sps:$4 sm:$0xff]   ;;  %v1041_v9 = vld [vmem:[#allocation2 + $0x54] ss:$8 sps:$4 sm:$0xff]   ;;  %v1045_v11 = vld [vmem:[#allocation2 + $0x50] ss:$8 sps:$4 sm:$0xff]  }
  0x12   :  { %281 = vmatpush1.bf16.msra.mxu0 %v1033_v3  ;;  %402 = vmatpush1.bf16.msra.mxu1 %v1034_v4  ;;  %v1043_v10 = vld [vmem:[#allocation2 + $0xd4] ss:$8 sps:$4 sm:$0xff]   ;;  %v1046_v12 = vld [vmem:[#allocation2 + $0xd0] ss:$8 sps:$4 sm:$0xff]   ;;  %v1047_v13 = vld [vmem:[#allocation2 + $0x44] ss:$8 sps:$4 sm:$0xff]  }
  0x13   :  { %282 = vmatprep.subr.bf16.mxu0 %v1035_v5  ;;  %403 = vmatprep.subr.bf16.mxu1 %v1037_v6  ;;  %v1049_v14 = vld [vmem:[#allocation2 + $0xc4] ss:$8 sps:$4 sm:$0xff]   ;;  %v1051_v15 = vld [vmem:[#allocation2 + $0x40] ss:$8 sps:$4 sm:$0xff]   ;;  %v1053_v17 = vld [vmem:[#allocation2 + $0x34] ss:$8 sps:$4 sm:$0xff]  }
  0x14   :  { %v1052_v16 = vld [vmem:[#allocation2 + $0xc0] ss:$8 sps:$4 sm:$0xff]   ;;  %v1055_v18 = vld [vmem:[#allocation2 + $0xb4] ss:$8 sps:$4 sm:$0xff]   ;;  %v1057_v19 = vld [vmem:[#allocation2 + $0x30] ss:$8 sps:$4 sm:$0xff]  }
  0x15   :  { %v1058_v20 = vld [vmem:[#allocation2 + $0xb0] ss:$8 sps:$4 sm:$0xff]   ;;  %v1059_v21 = vld [vmem:[#allocation2 + $0x24] ss:$8 sps:$4 sm:$0xff]   ;;  %v1063_v23 = vld [vmem:[#allocation2 + $0x20] ss:$8 sps:$4 sm:$0xff]  }
  0x16   :  { %283 = vmatpush1.bf16.msra.mxu0 %v1039_v7  ;;  %404 = vmatpush1.bf16.msra.mxu1 %v1040_v8  ;;  %v1061_v22 = vld [vmem:[#allocation2 + $0xa4] ss:$8 sps:$4 sm:$0xff]   ;;  %v1173_v25 = vmov 1934713408   ;;  %v1064_v27 = vld [vmem:[#allocation2 + $0xa0] ss:$8 sps:$4 sm:$0xff]  }
  0x17   :  { %284 = vmatprep.subr.bf16.mxu0 %v1041_v9  ;;  %405 = vmatprep.subr.bf16.mxu1 %v1043_v10  ;;  %v184_v26 = vunpack.c.l.s4 %v1173_v25  ;;  %v1065_v28 = vld [vmem:[#allocation2 + $0x14] ss:$8 sps:$4 sm:$0xff]   ;;  %v30_v30 = vld [vmem:[%s1297_s0] sm:$0x3]  ;;  %v31_v31 = vld [vmem:[%s1297_s0 + $0x2] sm:$0x3] }
  0x18   :  { %v1067_v29 = vld [vmem:[#allocation2 + $0x94] ss:$8 sps:$4 sm:$0xff]   ;;  %v1210_v32 = vshrl.u32 %v104_v24, 7  ;;  %v179_v34 = vshrl.u32 %v30_v30, 16  ;;  %v180_v35 = vshrl.u32 %v31_v31, 16  ;;  %v178_v40 = vpack.i.b16 %v31_v31, %v30_v30 }
  0x19   :  { %v185_v33 = vunpack.c.0.s8 %v184_v26  ;;  %v1069_v36 = vld [vmem:[#allocation2 + $0x10] ss:$8 sps:$4 sm:$0xff]   ;;  %v1071_v38 = vld [vmem:[#allocation2 + $0x4] ss:$8 sps:$4 sm:$0xff]   ;;  %v1075_v43 = vld [vmem:[#allocation2] ss:$8 sps:$4 sm:$0xff]  }
  0x1a   :  { %285 = vmatpush1.bf16.msra.mxu0 %v1045_v11  ;;  %406 = vmatpush1.bf16.msra.mxu1 %v1046_v12  ;;  %v1070_v37 = vld [vmem:[#allocation2 + $0x90] ss:$8 sps:$4 sm:$0xff]   ;;  %v1073_v39 = vld [vmem:[#allocation2 + $0x84] ss:$8 sps:$4 sm:$0xff]   ;;  %v181_v42 = vpack.i.b16 %v180_v35, %v179_v34  ;;  %v1076_v44 = vld [vmem:[#allocation2 + $0x80] ss:$8 sps:$4 sm:$0xff]  }
  0x1b   :  { %286 = vmatprep.subr.bf16.mxu0 %v1047_v13  ;;  %407 = vmatprep.subr.bf16.mxu1 %v1049_v14  ;;  %v188_v41 = vsub.s32 %v185_v33, %v1210_v32  ;;  %v1079_v45 = vld [vmem:[#allocation2 + $0x174] ss:$8 sps:$4 sm:$0xff]   ;;  %v1077_v49 = vld [vmem:[#allocation2 + $0x170] ss:$8 sps:$4 sm:$0xff]   ;;  %v1085_v51 = vld [vmem:[#allocation2 + $0x164] ss:$8 sps:$4 sm:$0xff]  }
  0x1c   :  { %v1082_v46 = vld [vmem:[#allocation2 + $0x1f4] ss:$8 sps:$4 sm:$0xff]   ;;  %v1080_v50 = vld [vmem:[#allocation2 + $0x1f0] ss:$8 sps:$4 sm:$0xff]   ;;  %v1088_v52 = vld [vmem:[#allocation2 + $0x1e4] ss:$8 sps:$4 sm:$0xff]  }
  0x1d   :  { %v1213_v47 = vrot.slane %v178_v40, %v188_v41  ;;  %v1215_v48 = vrot.slane %v181_v42, %v188_v41  ;;  %v1083_v53 = vld [vmem:[#allocation2 + $0x160] ss:$8 sps:$4 sm:$0xff]   ;;  %v1091_v55 = vld [vmem:[#allocation2 + $0x154] ss:$8 sps:$4 sm:$0xff]   ;;  %v1089_v57 = vld [vmem:[#allocation2 + $0x150] ss:$8 sps:$4 sm:$0xff]  }
  0x1e   :  { %287 = vmatpush1.bf16.msra.mxu0 %v1051_v15  ;;  %408 = vmatpush1.bf16.msra.mxu1 %v1052_v16  ;;  %v1086_v54 = vld [vmem:[#allocation2 + $0x1e0] ss:$8 sps:$4 sm:$0xff]   ;;  %v1094_v56 = vld [vmem:[#allocation2 + $0x1d4] ss:$8 sps:$4 sm:$0xff]   ;;  %v1092_v58 = vld [vmem:[#allocation2 + $0x1d0] ss:$8 sps:$4 sm:$0xff]  }
  0x1f   :  { %288 = vmatprep.subr.bf16.mxu0 %v1053_v17  ;;  %409 = vmatprep.subr.bf16.mxu1 %v1055_v18  ;;  %v1097_v59 = vld [vmem:[#allocation2 + $0x144] ss:$8 sps:$4 sm:$0xff]   ;;  %v1095_v62 = vld [vmem:[#allocation2 + $0x140] ss:$8 sps:$4 sm:$0xff]   ;;  %v1103_v1 = vld [vmem:[#allocation2 + $0x134] ss:$8 sps:$4 sm:$0xff]   ;;  %v190_v17 = vcombine.high %v1213_v47, %v1172_v0  ;;  %v199_v18 = vcombine.high %v1215_v48, %v1172_v0 }
  0x20   :  { %v1100_v60 = vld [vmem:[#allocation2 + $0x1c4] ss:$8 sps:$4 sm:$0xff]   ;;  %v1098_v63 = vld [vmem:[#allocation2 + $0x1c0] ss:$8 sps:$4 sm:$0xff]   ;;  %v1106_v2 = vld [vmem:[#allocation2 + $0x1b4] ss:$8 sps:$4 sm:$0xff]  }
  0x21   :  { %v1224_v61 = vld [vmem:[%s1299_s2 + $0x8] sm:$0x77]  ;;  %v1101_v3 = vld [vmem:[#allocation2 + $0x130] ss:$8 sps:$4 sm:$0xff]   ;;  %v1115_v9 = vld [vmem:[#allocation2 + $0x114] ss:$8 sps:$4 sm:$0xff]  }
  0x22   :  { %289 = vmatpush1.bf16.msra.mxu0 %v1057_v19  ;;  %410 = vmatpush1.bf16.msra.mxu1 %v1058_v20  ;;  %v1104_v4 = vld [vmem:[#allocation2 + $0x1b0] ss:$8 sps:$4 sm:$0xff]   ;;  %v1109_v5 = vld [vmem:[#allocation2 + $0x124] ss:$8 sps:$4 sm:$0xff]   ;;  %v1107_v7 = vld [vmem:[#allocation2 + $0x120] ss:$8 sps:$4 sm:$0xff]  }
  0x23   :  { %290 = vmatprep.subr.bf16.mxu0 %v1059_v21  ;;  %411 = vmatprep.subr.bf16.mxu1 %v1061_v22  ;;  %v1112_v6 = vld [vmem:[#allocation2 + $0x1a4] ss:$8 sps:$4 sm:$0xff]   ;;  %v1110_v8 = vld [vmem:[#allocation2 + $0x1a0] ss:$8 sps:$4 sm:$0xff]   ;;  %v1118_v10 = vld [vmem:[#allocation2 + $0x194] ss:$8 sps:$4 sm:$0xff]  }
  0x24   :  { %805 = vperm.xlu1 %1028, %v1224_v61   ;;  %v1113_v11 = vld [vmem:[#allocation2 + $0x110] ss:$8 sps:$4 sm:$0xff]   ;;  %v1121_v13 = vld [vmem:[#allocation2 + $0x104] ss:$8 sps:$4 sm:$0xff]   ;;  %v1119_v15 = vld [vmem:[#allocation2 + $0x100] ss:$8 sps:$4 sm:$0xff]  }
  0x25   :  { %v1116_v12 = vld [vmem:[#allocation2 + $0x190] ss:$8 sps:$4 sm:$0xff]   ;;  %v1124_v14 = vld [vmem:[#allocation2 + $0x184] ss:$8 sps:$4 sm:$0xff]   ;;  %v1122_v16 = vld [vmem:[#allocation2 + $0x180] ss:$8 sps:$4 sm:$0xff]  }
  0x26   :  { %291 = vmatpush1.bf16.msra.mxu0 %v1063_v23  ;;  %412 = vmatpush1.bf16.msra.mxu1 %v1064_v27  ;;  %v1234_v19 = vld [vmem:[%s1299_s2 + $0x10] sm:$0x77]  ;;  %v106_v20 = vsub.s32 0, %v1210_v32  ;;  %v1241_v21 = vld [vmem:[%s1299_s2] sm:$0x77]  ;;  %v1245_v22 = vsub.s32 1, %v1210_v32 }
  0x27   :  { %292 = vmatprep.subr.bf16.mxu0 %v1065_v28  ;;  %413 = vmatprep.subr.bf16.mxu1 %v1067_v29  ;;  %v1250_v26 = vsub.s32 5, %v1210_v32  ;;  %vm899_vm1 = vcmask 1041409   ;;  %vm901_vm2 = vcmask 1042434   ;;  %vm903_vm3 = vcmask 1043459  }
  0x28   :  { %816 = vperm.xlu1 %1028, %v1234_v19   ;;  %v107_v23 = vrot.slane %v1241_v21, %v106_v20  ;;  %v115_v25 = vrot.slane %v1224_v61, %v106_v20  ;;  %v703_v31 = vrot.slane %v1224_v61, %v1245_v22  ;;  %v695_v33 = vrot.slane %v1241_v21, %v1245_v22 }
  0x29   :  { %v707_v34 = vrot.slane %v1224_v61, %v1250_v26  ;;  %v699_v35 = vrot.slane %v1241_v21, %v1250_v26  ;;  %vm938_vm4 = vcmask 25600  }
  0x2a   :  { %293 = vmatpush1.bf16.msra.mxu0 %v1069_v36  ;;  %414 = vmatpush1.bf16.msra.mxu1 %v1070_v37  ;;  %v147_v29 = vrot.slane %v107_v23, %v106_v20  ;;  %v155_v30 = vrot.slane %v115_v25, %v106_v20  ;;  %v743_v42 = vrot.slane %v703_v31, %v1245_v22 }
  0x2b   :  { %294 = vmatprep.subr.bf16.mxu0 %v1071_v38  ;;  %415 = vmatprep.subr.bf16.mxu1 %v1073_v39 }
  0x2e   :  { %295 = vmatpush1.bf16.msra.mxu0 %v1075_v43  ;;  %416 = vmatpush1.bf16.msra.mxu1 %v1076_v44  ;;  %v735_v43 = vrot.slane %v695_v33, %v1245_v22 }
  0x2f   :  { %522 = vmatprep.subr.bf16.mxu0 %v1079_v45  ;;  %643 = vmatprep.subr.bf16.mxu1 %v1082_v46  ;;  %v747_v46 = vrot.slane %v707_v34, %v1245_v22 }
  0x31   :  { %313 = vmatmul.mubr.bf16.vlgmr.msra.gmra.mxu0 %v1213_v47  ;;  %434 = vmatmul.mubr.bf16.vlgmr.msra.gmra.mxu1 %v1215_v48  ;;  %v739_v47 = vrot.slane %v699_v35, %v1245_v22 }
  0x32   :  { %523 = vmatpush1.bf16.msra.mxu0 %v1077_v49  ;;  %644 = vmatpush1.bf16.msra.mxu1 %v1080_v50 }
  0x33   :  { %524 = vmatprep.subr.bf16.mxu0 %v1085_v51  ;;  %645 = vmatprep.subr.bf16.mxu1 %v1088_v52 }
  0x34   :  { %554 = vmatprep.mubr.bf16.mxu0 %v1172_v0  ;;  %675 = vmatprep.mubr.bf16.mxu1 %v1172_v0  ;;  %v110_v0 = vsub.s32 4, %v1210_v32 }
  0x36   :  { %525 = vmatpush1.bf16.msra.mxu0 %v1083_v53  ;;  %646 = vmatpush1.bf16.msra.mxu1 %v1086_v54  ;;  %v111_v27 = vrot.slane %v1241_v21, %v110_v0  ;;  %v119_v28 = vrot.slane %v1224_v61, %v110_v0 }
  0x37   :  { %526 = vmatprep.subr.bf16.mxu0 %v1091_v55  ;;  %647 = vmatprep.subr.bf16.mxu1 %v1094_v56 }
  0x38   :  { %v151_v36 = vrot.slane %v111_v27, %v106_v20  ;;  %v159_v37 = vrot.slane %v119_v28, %v106_v20 }
  0x3a   :  { %527 = vmatpush1.bf16.msra.mxu0 %v1089_v57  ;;  %648 = vmatpush1.bf16.msra.mxu1 %v1092_v58 }
  0x3b   :  { %528 = vmatprep.subr.bf16.mxu0 %v1097_v59  ;;  %649 = vmatprep.subr.bf16.mxu1 %v1100_v60 }
  0x3e   :  { %529 = vmatpush1.bf16.msra.mxu0 %v1095_v62  ;;  %650 = vmatpush1.bf16.msra.mxu1 %v1098_v63 }
  0x3f   :  { %530 = vmatprep.subr.bf16.mxu0 %v1103_v1  ;;  %651 = vmatprep.subr.bf16.mxu1 %v1106_v2 }
  0x42   :  { %531 = vmatpush1.bf16.msra.mxu0 %v1101_v3  ;;  %652 = vmatpush1.bf16.msra.mxu1 %v1104_v4 }
  0x43   :  { %532 = vmatprep.subr.bf16.mxu0 %v1109_v5  ;;  %653 = vmatprep.subr.bf16.mxu1 %v1112_v6  ;;  %v99_v5 = vld [vmem:[%s1299_s2 + $0x18] sm:$0x77]  ;;  %v123_v6 = vrot.slane %v1234_v19, %v106_v20  ;;  %s1175_s2 = smov [#allocation5]  }
  0x44   :  { %s946_s29 = sshll.u32 %s1175_s2, 4  ;;  %s947_s29 = int_to_ptr.vmem [resolvable:$true] %s946_s29 }
  0x45   :  { %s1145_s30 = scalar_lea.vmem %s947_s29, 32  ;;  %p1150_p6 = scmp.lt.s32.totalorder %s947_s29, %s947_s29 }
  0x46   :  { %533 = vmatpush1.bf16.msra.mxu0 %v1107_v7  ;;  %654 = vmatpush1.bf16.msra.mxu1 %v1110_v8  ;;  %v131_v7 = vrot.slane %v99_v5, %v106_v20  ;;  %v127_v8 = vrot.slane %v1234_v19, %v110_v0  ;;  %p1146_p5 = scmp.ne.s32.totalorder %s947_s29, %s1145_s30  ;;  %p1151_p7 = scmp.lt.s32.totalorder %s1145_s30, %s1145_s30 }
  0x47   :  { %534 = vmatprep.subr.bf16.mxu0 %v1115_v9  ;;  %655 = vmatprep.subr.bf16.mxu1 %v1118_v10  ;;  %v135_v9 = vrot.slane %v99_v5, %v110_v0  ;;  %v163_v10 = vrot.slane %v123_v6, %v106_v20 }
  0x48   :  { %p1152_p8 = por %p1151_p7, %p1150_p6 }
  0x4a   :  { %535 = vmatpush1.bf16.msra.mxu0 %v1113_v11  ;;  %656 = vmatpush1.bf16.msra.mxu1 %v1116_v12  ;;  %v711_v11 = vrot.slane %v1234_v19, %v1245_v22  ;;  %v171_v12 = vrot.slane %v131_v7, %v106_v20  ;;  %p1153_p9 = pnand %p1152_p8, %p1146_p5 }
  0x4b   :  { %536 = vmatprep.subr.bf16.mxu0 %v1121_v13  ;;  %657 = vmatprep.subr.bf16.mxu1 %v1124_v14  ;;  %v719_v13 = vrot.slane %v99_v5, %v1245_v22  ;;  %v715_v14 = vrot.slane %v1234_v19, %v1250_v26 }
  0x4c   :  { %v751_v27 = vrot.slane %v711_v11, %v1245_v22 }
  0x4d   :  { %v759_v28 = vrot.slane %v719_v13, %v1245_v22 }
  0x4e   :  { %537 = vmatpush1.bf16.msra.mxu0 %v1119_v15  ;;  %658 = vmatpush1.bf16.msra.mxu1 %v1122_v16  ;;  %v723_v15 = vrot.slane %v99_v5, %v1250_v26  ;;  %v167_v16 = vrot.slane %v127_v8, %v106_v20 }
  0x50   :  { %v763_v33 = vrot.slane %v723_v15, %v1245_v22 }
  0x51   :  { %555 = vmatmul.mubr.bf16.vlgmr.msra.gmra.mxu0 %v190_v17  ;;  %676 = vmatmul.mubr.bf16.vlgmr.msra.gmra.mxu1 %v199_v18  ;;  %v175_v17 = vrot.slane %v135_v9, %v106_v20 }
  0xf1   :  { %v314_v38 = vpop.f32.mrf.mxu0  ;;  %v435_v39 = vpop.f32.mrf.mxu1 }
  0xf2   :  { %v315_v40 = vadd.f32 %v314_v38, %v147_v29  ;;  %v436_v41 = vadd.f32 %v435_v39, %v155_v30  ;;  %v755_v30 = vrot.slane %v715_v14, %v1245_v22 }
  0xf3   :  { %v316_v44 = vpop.f32.mrf.mxu0  ;;  %v437_v45 = vpop.f32.mrf.mxu1 }
  0xf4   :  { %v684_v48 = vmax.f32 %v315_v40, 0.0  ;;  %v686_v49 = vmax.f32 %v436_v41, 0.0  ;;  %v317_v50 = vadd.f32 %v316_v44, %v151_v36  ;;  %v438_v51 = vadd.f32 %v437_v45, %v159_v37 }
  0xf5   :  { %v318_v52 = vpop.f32.mrf.mxu0  ;;  %v439_v53 = vpop.f32.mrf.mxu1 }
  0xf6   :  { %v766_v54 = vmul.f32 %v743_v42, %v686_v49  ;;  %v685_v55 = vmax.f32 %v317_v50, 0.0  ;;  %v687_v56 = vmax.f32 %v438_v51, 0.0  ;;  %v764_v57 = vmul.f32 %v735_v43, %v684_v48 }
  0xf7   :  { %v319_v58 = vpop.f32.mrf.mxu0  ;;  %v440_v59 = vpop.f32.mrf.mxu1  ;;  %v1174_v51 = vmov 839922192  }
  0xf8   :  { %v767_v60 = vmul.f32 %v747_v46, %v687_v56  ;;  %v765_v61 = vmul.f32 %v739_v47, %v685_v55  ;;  %v773_v62 = vsel %vm772_vm0, %v764_v57, 0.0  ;;  %v778_v1 = vsel %vm772_vm0, %v766_v54, 0.0  ;;  %v806_v58 = vpop.permute.xlu1 %805 }
  0xf9   :  { %v843_v56 = vsub.s32 2, %v1210_v32 }
  0xfa   :  { %v774_v63 = vsel %vm772_vm0, %v765_v61, 0.0  ;;  %v779_v2 = vsel %vm772_vm0, %v767_v60, 0.0 }
  0xfb   :  { %v775_v3 = vadd.f32 %v774_v63, %v773_v62  ;;  %v780_v4 = vadd.f32 %v779_v2, %v778_v1 }
  0xfc   :  { %v817_v1 = vpop.permute.xlu1 %816 }
  0xfd   :  { %776 = vadd.xlane.f32.xlu0 %v775_v3 }
 0x101   :  { %781 = vadd.xlane.f32.xlu0 %v780_v4 }
 0x111   :  { %v556_v18 = vpop.f32.mrf.mxu0  ;;  %v677_v23 = vpop.f32.mrf.mxu1 }
 0x112   :  { %v557_v25 = vadd.f32 %v556_v18, %v163_v10  ;;  %v678_v0 = vadd.f32 %v677_v23, %v171_v12  ;;  %v882_v12 = vand.u32 127, %v104_v24 }
 0x113   :  { %v558_v29 = vpop.f32.mrf.mxu0  ;;  %v679_v31 = vpop.f32.mrf.mxu1 }
 0x114   :  { %v688_v34 = vmax.f32 %v557_v25, 0.0  ;;  %v690_v19 = vmax.f32 %v678_v0, 0.0  ;;  %v559_v35 = vadd.f32 %v558_v29, %v167_v16  ;;  %v680_v26 = vadd.f32 %v679_v31, %v175_v17 }
 0x115   :  { %v560_v36 = vpop.f32.mrf.mxu0  ;;  %v681_v20 = vpop.f32.mrf.mxu1  ;;  %v885_v14 = vsub.s32 %v882_v12, %v1210_v32 }
 0x116   :  { %v768_v37 = vmul.f32 %v751_v27, %v688_v34  ;;  %v689_v38 = vmax.f32 %v559_v35, 0.0  ;;  %v691_v39 = vmax.f32 %v680_v26, 0.0  ;;  %v770_v42 = vmul.f32 %v759_v28, %v690_v19 }
 0x117   :  { %v682_v40 = vpop.f32.mrf.mxu1  ;;  %794 = vperm.xlu0 %1027, %v1241_v21   ;;  %v561_v41 = vpop.f32.mrf.mxu0  ;;  %v798_v21 = vunpack.c.l.s4 %v1174_v51 }
 0x118   :  { %v769_v43 = vmul.f32 %v755_v30, %v689_v38  ;;  %v771_v44 = vmul.f32 %v763_v33, %v691_v39  ;;  %v783_v45 = vsel %vm772_vm0, %v768_v37, 0.0  ;;  %v788_v47 = vsel %vm772_vm0, %v770_v42, 0.0 }
 0x119   :  { %v799_v52 = vunpack.c.0.s8 %v798_v21 }
 0x11a   :  { %v784_v22 = vsel %vm772_vm0, %v769_v43, 0.0  ;;  %v789_v48 = vsel %vm772_vm0, %v771_v44, 0.0 }
 0x11b   :  { %v785_v46 = vadd.f32 %v784_v22, %v783_v45  ;;  %v790_v49 = vadd.f32 %v789_v48, %v788_v47  ;;  %v802_v54 = vsub.s32 %v799_v52, %v1210_v32 }
 0x11d   :  { %786 = vadd.xlane.f32.xlu1 %v785_v46  ;;  %v814_v59 = vrot.slane %v806_v58, %v802_v54  ;;  %v825_v2 = vrot.slane %v817_v1, %v802_v54 }
 0x11f   :  { %v848_v62 = vrot.slane %v814_v59, %v843_v56  ;;  %v852_v3 = vrot.slane %v825_v2, %v843_v56 }
 0x121   :  { %791 = vadd.xlane.f32.xlu1 %v790_v49 }
 0x132   :  { %827 = vperm.xlu1 %1028, %v99_v5  }
 0x186   :  { %v777_v50 = vpop.xlane.xlu0 %776 }
 0x18a   :  { %v782_v53 = vpop.xlane.xlu0 %781 }
 0x18b   :  { %v862_v63 = vadd.f32 %v848_v62, %v782_v53 }
 0x192   :  { %v795_v55 = vpop.permute.xlu0 %794 }
 0x193   :  { %v803_v57 = vrot.slane %v795_v55, %v802_v54 }
 0x195   :  { %v844_v60 = vrot.slane %v803_v57, %v843_v56 }
 0x197   :  { %v861_v61 = vadd.f32 %v844_v60, %v777_v50 }
 0x199   :  { %870 = vperm.xlu1 %1028, %v861_v61  }
 0x19d   :  { %873 = vperm.xlu1 %1028, %v862_v63  }
 0x1a6   :  { %v787_v4 = vpop.xlane.xlu1 %786 }
 0x1a7   :  { %v863_v5 = vadd.f32 %v852_v3, %v787_v4 }
 0x1a9   :  { %876 = vperm.xlu1 %1028, %v863_v5  }
 0x1aa   :  { %v792_v6 = vpop.xlane.xlu1 %791 }
 0x1ae   :  { %v828_v7 = vpop.permute.xlu1 %827 }
 0x1af   :  { %v836_v8 = vrot.slane %v828_v7, %v802_v54 }
 0x1b1   :  { %v856_v9 = vrot.slane %v836_v8, %v843_v56 }
 0x1b3   :  { %v864_v10 = vadd.f32 %v856_v9, %v792_v6 }
 0x1b5   :  { %879 = vperm.xlu1 %1028, %v864_v10  }
 0x214   :  { %v871_v11 = vpop.permute.xlu1 %870 }
 0x215   :  { %v886_v18 = vrot.slane %v871_v11, %v885_v14 }
 0x218   :  { %v874_v13 = vpop.permute.xlu1 %873 }
 0x219   :  { %v890_v16 = vrot.slane %v874_v13, %v885_v14 }
 0x21b   :  { %v900_v25 = vsel %vm899_vm1, %v890_v16, %v886_v18 }
 0x224   :  { %v877_v15 = vpop.permute.xlu1 %876 }
 0x225   :  { %v894_v17 = vrot.slane %v877_v15, %v885_v14 }
 0x227   :  { %v902_v0 = vsel %vm901_vm2, %v894_v17, %v900_v25 }
 0x230   :  { %v880_v23 = vpop.permute.xlu1 %879 }
 0x231   :  { %v898_v27 = vrot.slane %v880_v23, %v885_v14 }
 0x233   :  { %v904_v28 = vsel %vm903_vm3, %v898_v27, %v902_v0 }
 0x234   :  { %906 = vxpose.xlu1.b32.start.end [1/1] (short) (narrow) %v904_v28, 8 }
 0x2b0   :  { %v922_v24 = vpop.trf.xlu1 }
 0x2b1   :  { %939 = vst.msk [vmem:[#allocation5] sm:$0x3] %vm938_vm4, %v922_v24 }
 0x2b2   :  { %1156 = shalt.err (!%p1153_p9)
}
 0x2b3   :  { %949 = dma.vmem_to_hbm [thread:$0]  %s947_s29, 32, %s1300_s3, [#allocation4]  }
 0x2b4   :  { %1167 = dma.done.wait [#allocation4], 32  }
 0x2b5   :  { %1168 = vsyncadd [#allocation4], 4294967264 }
 0x2b6   :  { %953 = vsyncpa [#allocation3], 1 }
 0x2b7   :  { %954 = vsyncpa [#allocation4], 1 }

</bundles_post_ra>
